<compile_context>
chip_gen: v5e
topology: v5e:2x2
jax: 0.10.0
libtpu: 0.0.40
codegen_flags: <defaults>
</compile_context>

<pallas_src>
import numpy as np
import jax
import jax.numpy as jnp
from jax.experimental import pallas as pl
from jax.experimental.pallas import tpu as pltpu

N_NODES = 8
F_IN, F_H1, F_H2, F_OUT = 3, 16, 32, 2
K_IN = 8        # contraction pad for X cols / W1 rows (3 -> 8)
LANES = 128     # lane-dense width for every stage (and the kernel output)

# Weight-slab layout (rows x 128 lanes, all padding is exactly zero):
#   rows [  0,   8) : W1  (real 3 x 16)
#   rows [  8, 136) : W2  (real 16 x 32, rows padded to 128)
#   rows [136, 264) : W3  (real 32 x 2,  rows padded to 128)
#   rows [264, 272) : b1 / b2 / b3 in rows 264 / 265 / 266
W1_R0, W2_R0, W3_R0, B_R0 = 0, 8, 136, 264
SLAB_ROWS = 272

GRAPHS_PER_PACK = 16                      # 16 graphs x 8 nodes = 128 rows / grid step
PACK_ROWS = GRAPHS_PER_PACK * N_NODES     # 128


def gcn3_kernel(a_ref, x_ref, w_ref, o_ref):
    # a_ref: (m, m) or (1, m, m) normalized (block-diagonal) adjacency
    a = a_ref[0] if len(a_ref.shape) == 3 else a_ref[...]
    w1 = w_ref[W1_R0:W1_R0 + K_IN, :]        # (8, 128)
    w2 = w_ref[W2_R0:W2_R0 + LANES, :]       # (128, 128)
    w3 = w_ref[W3_R0:W3_R0 + LANES, :]       # (128, 128)
    b1 = w_ref[B_R0 + 0:B_R0 + 1, :]         # (1, 128)
    b2 = w_ref[B_R0 + 1:B_R0 + 2, :]
    b3 = w_ref[B_R0 + 2:B_R0 + 3, :]

    # layer 1: relu((A @ X) @ W1 + b1)   (aggregate first, K = 8)
    h = jnp.dot(a, x_ref[...], preferred_element_type=jnp.float32)            # (m, 8)
    h = jnp.maximum(jnp.dot(h, w1, preferred_element_type=jnp.float32) + b1, 0.0)
    # layer 2: relu((A @ H) @ W2 + b2)   (zero rows 16..127 of W2 -> no lane slice)
    h = jnp.dot(a, h, preferred_element_type=jnp.float32)                     # (m, 128)
    h = jnp.maximum(jnp.dot(h, w2, preferred_element_type=jnp.float32) + b2, 0.0)
    # layer 3: (A @ H) @ W3 + b3         (no relu, like the module)
    h = jnp.dot(a, h, preferred_element_type=jnp.float32)
    o_ref[...] = jnp.dot(h, w3, preferred_element_type=jnp.float32) + b3


def _gcn_cost(num_packs, m):
    per_pack = 2 * (m * m * K_IN + m * K_IN * LANES
                    + 2 * (m * m * LANES + m * LANES * LANES))
    bytes_accessed = 4 * (num_packs * (m * m + m * K_IN + m * LANES) + SLAB_ROWS * LANES)
    return pl.CostEstimate(flops=int(num_packs * per_pack), transcendentals=0,
                           bytes_accessed=int(bytes_accessed))


_VMEM = pl.BlockSpec(memory_space=pltpu.MemorySpace.VMEM)


@jax.jit
def rectangle_gnn_forward(x, a_hat, w_slab):
    """Single-graph forward (matches RectangleGNN.forward). x: (N, 3)."""
    n = x.shape[0]
    xp = jnp.zeros((n, K_IN), jnp.float32).at[:, :F_IN].set(x.astype(jnp.float32))
    out = pl.pallas_call(
        gcn3_kernel,
        out_shape=jax.ShapeDtypeStruct((n, LANES), jnp.float32),
        in_specs=[_VMEM, _VMEM, _VMEM],      # whole-array VMEM residency, no grid
        out_specs=_VMEM,
        cost_estimate=_gcn_cost(1, n),
    )(a_hat, xp, w_slab)
    return out[:, :F_OUT]


@jax.jit
def rectangle_gnn_forward_batched(x_all, a_pack, w_slab):
    """Many graphs packed 16-per-128-row block. x_all: (P*128, 3), a_pack: (P,128,128)."""
    rows = x_all.shape[0]
    num_packs = a_pack.shape[0]
    xp = jnp.zeros((rows, K_IN), jnp.float32).at[:, :F_IN].set(x_all.astype(jnp.float32))
    out = pl.pallas_call(
        gcn3_kernel,
        out_shape=jax.ShapeDtypeStruct((rows, LANES), jnp.float32),
        grid=(num_packs,),
        in_specs=[
            pl.BlockSpec((1, PACK_ROWS, PACK_ROWS), lambda i: (i, 0, 0)),
            pl.BlockSpec((PACK_ROWS, K_IN), lambda i: (i, 0)),
            pl.BlockSpec((SLAB_ROWS, LANES), lambda i: (0, 0)),   # weights stay VMEM-resident
        ],
        out_specs=pl.BlockSpec((PACK_ROWS, LANES), lambda i: (i, 0)),
        compiler_params=pltpu.CompilerParams(dimension_semantics=("parallel",)),
        cost_estimate=_gcn_cost(num_packs, PACK_ROWS),
    )(a_pack, xp, w_slab)
    return out[:, :F_OUT]


# ----------------------------- one-time glue --------------------------------

def build_a_hat(edge_index, num_nodes):
    """Dense GCN normalization: D^{-1/2} (A + I) D^{-1/2} (plain JAX, done once)."""
    a = jnp.zeros((num_nodes, num_nodes), jnp.float32)
    a = a.at[edge_index[0], edge_index[1]].set(1.0)
    a = a + jnp.eye(num_nodes, dtype=jnp.float32)          # add self loops
    deg = a.sum(axis=1)
    dinv = jnp.where(deg > 0, 1.0 / jnp.sqrt(deg), 0.0)
    return a * dinv[:, None] * dinv[None, :]


def pack_weight_slab(params):
    """Coalesce all weights/biases into one zero-padded (272, 128) slab (done once)."""
    (w1, b1), (w2, b2), (w3, b3) = params
    slab = jnp.zeros((SLAB_ROWS, LANES), jnp.float32)
    slab = slab.at[W1_R0:W1_R0 + F_IN, :F_H1].set(w1.astype(jnp.float32))
    slab = slab.at[W2_R0:W2_R0 + F_H1, :F_H2].set(w2.astype(jnp.float32))
    slab = slab.at[W3_R0:W3_R0 + F_H2, :F_OUT].set(w3.astype(jnp.float32))
    slab = slab.at[B_R0 + 0, :F_H1].set(b1.astype(jnp.float32))
    slab = slab.at[B_R0 + 1, :F_H2].set(b2.astype(jnp.float32))
    slab = slab.at[B_R0 + 2, :F_OUT].set(b3.astype(jnp.float32))
    return slab


if __name__ == "__main__":
    # two rectangles: nodes 0-3 and 4-7; undirected edges -> both directions,
    # mirroring `edge_index = torch.tensor(edge_index).t().contiguous()`
    edges = [(0, 1), (1, 2), (2, 3), (3, 0), (4, 5), (5, 6), (6, 7), (7, 4)]
    ei = np.array(edges + [(j, i) for (i, j) in edges], dtype=np.int32).T    # (2, 2E)
    edge_index = jnp.asarray(ei)

    key = jax.random.PRNGKey(0)
    k_x, k_b, k1, k2, k3 = jax.random.split(key, 5)
    x = jax.random.normal(k_x, (N_NODES, F_IN), jnp.float32)

    def glorot(k, fan_in, fan_out):  # deterministic synthetic init (GCNConv-style)
        lim = float(np.sqrt(6.0 / (fan_in + fan_out)))
        return jax.random.uniform(k, (fan_in, fan_out), jnp.float32, -lim, lim)

    params = [
        (glorot(k1, F_IN, F_H1), jnp.zeros((F_H1,), jnp.float32)),
        (glorot(k2, F_H1, F_H2), jnp.zeros((F_H2,), jnp.float32)),
        (glorot(k3, F_H2, F_OUT), jnp.zeros((F_OUT,), jnp.float32)),
    ]

    # one-time glue, hoisted out of the per-forward path
    a_hat = build_a_hat(edge_index, N_NODES)
    w_slab = jax.block_until_ready(pack_weight_slab(params))

    # pure-JAX reference (same math as the torch module with normalized adjacency)
    def ref_single(xx):
        h = jnp.maximum(a_hat @ (xx @ params[0][0]) + params[0][1], 0.0)
        h = jnp.maximum(a_hat @ (h @ params[1][0]) + params[1][1], 0.0)
        return a_hat @ (h @ params[2][0]) + params[2][1]

    # --- single-graph forward (the module's semantics) ---
    out = jax.block_until_ready(rectangle_gnn_forward(x, a_hat, w_slab))
    np.testing.assert_allclose(np.asarray(out), np.asarray(ref_single(x)),
                               atol=1e-5, rtol=1e-5)
    assert out.shape == (N_NODES, F_OUT)

    # --- batched forward: 2 packs x 16 graphs x 8 nodes = 256 rows ---
    num_packs = 2
    n_graphs = num_packs * GRAPHS_PER_PACK
    xg = jax.random.normal(k_b, (n_graphs, N_NODES, F_IN), jnp.float32)
    a_block = jnp.kron(jnp.eye(GRAPHS_PER_PACK, dtype=jnp.float32), a_hat)   # (128, 128)
    a_pack = jnp.broadcast_to(a_block, (num_packs, PACK_ROWS, PACK_ROWS))
    out_b = jax.block_until_ready(
        rectangle_gnn_forward_batched(xg.reshape(-1, F_IN), a_pack, w_slab))
    ref_b = jax.vmap(ref_single)(xg).reshape(-1, F_OUT)
    np.testing.assert_allclose(np.asarray(out_b), np.asarray(ref_b),
                               atol=1e-4, rtol=1e-4)
    assert out_b.shape == (n_graphs * N_NODES, F_OUT)

    print("KERNEL_OK")
</pallas_src>

<mosaic_0001>
module attributes {stable_mosaic.version = 11 : i64} {
  func.func @gcn3_kernel(%arg0: memref<8x8xf32, #tpu.memory_space<vmem>>, %arg1: memref<8x8xf32, #tpu.memory_space<vmem>>, %arg2: memref<272x128xf32, #tpu.memory_space<vmem>>, %arg3: memref<8x128xf32, #tpu.memory_space<vmem>>) attributes {dimension_semantics = [], scalar_prefetch = 0 : i64, scratch_operands = 0 : i64, tpu.core_type = #tpu.core_type<tc>} {
    %c0 = arith.constant 0 : index
    %c0_0 = arith.constant 0 : index
    %0 = vector.load %arg0[%c0, %c0_0] : memref<8x8xf32, #tpu.memory_space<vmem>>, vector<8x8xf32>
    %c0_1 = arith.constant 0 : index
    %c0_2 = arith.constant 0 : index
    %1 = vector.load %arg2[%c0_1, %c0_2] : memref<272x128xf32, #tpu.memory_space<vmem>>, vector<8x128xf32>
    %c8 = arith.constant 8 : index
    %c0_3 = arith.constant 0 : index
    %2 = vector.load %arg2[%c8, %c0_3] : memref<272x128xf32, #tpu.memory_space<vmem>>, vector<128x128xf32>
    %c136 = arith.constant 136 : index
    %c0_4 = arith.constant 0 : index
    %3 = vector.load %arg2[%c136, %c0_4] : memref<272x128xf32, #tpu.memory_space<vmem>>, vector<128x128xf32>
    %c264 = arith.constant 264 : index
    %c0_5 = arith.constant 0 : index
    %4 = vector.load %arg2[%c264, %c0_5] : memref<272x128xf32, #tpu.memory_space<vmem>>, vector<1x128xf32>
    %c265 = arith.constant 265 : index
    %c0_6 = arith.constant 0 : index
    %5 = vector.load %arg2[%c265, %c0_6] : memref<272x128xf32, #tpu.memory_space<vmem>>, vector<1x128xf32>
    %c266 = arith.constant 266 : index
    %c0_7 = arith.constant 0 : index
    %6 = vector.load %arg2[%c266, %c0_7] : memref<272x128xf32, #tpu.memory_space<vmem>>, vector<1x128xf32>
    %c0_8 = arith.constant 0 : index
    %c0_9 = arith.constant 0 : index
    %7 = vector.load %arg1[%c0_8, %c0_9] : memref<8x8xf32, #tpu.memory_space<vmem>>, vector<8x8xf32>
    %cst = arith.constant dense<0.000000e+00> : vector<8x8xf32>
    %8 = tpu.matmul %0, %7, %cst {dimension_numbers = #tpu.dot_dimension_numbers<[1], [0], [0], [1], [0, 0, 1, 1], [], []>} : vector<8x8xf32>, vector<8x8xf32>, vector<8x8xf32> -> vector<8x8xf32>
    %cst_10 = arith.constant dense<0.000000e+00> : vector<8x128xf32>
    %9 = tpu.matmul %8, %1, %cst_10 {dimension_numbers = #tpu.dot_dimension_numbers<[1], [0], [0], [1], [0, 0, 1, 1], [], []>} : vector<8x8xf32>, vector<8x128xf32>, vector<8x128xf32> -> vector<8x128xf32>
    %10 = vector.broadcast %4 : vector<1x128xf32> to vector<8x128xf32>
    %11 = arith.addf %9, %10 : vector<8x128xf32>
    %cst_11 = arith.constant 0.000000e+00 : f32
    %12 = vector.broadcast %cst_11 : f32 to vector<8x128xf32>
    %13 = arith.maximumf %11, %12 : vector<8x128xf32>
    %cst_12 = arith.constant dense<0.000000e+00> : vector<8x128xf32>
    %14 = tpu.matmul %0, %13, %cst_12 {dimension_numbers = #tpu.dot_dimension_numbers<[1], [0], [0], [1], [0, 0, 1, 1], [], []>} : vector<8x8xf32>, vector<8x128xf32>, vector<8x128xf32> -> vector<8x128xf32>
    %cst_13 = arith.constant dense<0.000000e+00> : vector<8x128xf32>
    %15 = tpu.matmul %14, %2, %cst_13 {dimension_numbers = #tpu.dot_dimension_numbers<[1], [0], [0], [1], [0, 0, 1, 1], [], []>} : vector<8x128xf32>, vector<128x128xf32>, vector<8x128xf32> -> vector<8x128xf32>
    %16 = vector.broadcast %5 : vector<1x128xf32> to vector<8x128xf32>
    %17 = arith.addf %15, %16 : vector<8x128xf32>
    %cst_14 = arith.constant 0.000000e+00 : f32
    %18 = vector.broadcast %cst_14 : f32 to vector<8x128xf32>
    %19 = arith.maximumf %17, %18 : vector<8x128xf32>
    %cst_15 = arith.constant dense<0.000000e+00> : vector<8x128xf32>
    %20 = tpu.matmul %0, %19, %cst_15 {dimension_numbers = #tpu.dot_dimension_numbers<[1], [0], [0], [1], [0, 0, 1, 1], [], []>} : vector<8x8xf32>, vector<8x128xf32>, vector<8x128xf32> -> vector<8x128xf32>
    %cst_16 = arith.constant dense<0.000000e+00> : vector<8x128xf32>
    %21 = tpu.matmul %20, %3, %cst_16 {dimension_numbers = #tpu.dot_dimension_numbers<[1], [0], [0], [1], [0, 0, 1, 1], [], []>} : vector<8x128xf32>, vector<128x128xf32>, vector<8x128xf32> -> vector<8x128xf32>
    %22 = vector.broadcast %6 : vector<1x128xf32> to vector<8x128xf32>
    %23 = arith.addf %21, %22 : vector<8x128xf32>
    %c0_17 = arith.constant 0 : index
    %c0_18 = arith.constant 0 : index
    %24 = vector.load %arg3[%c0_17, %c0_18] : memref<8x128xf32, #tpu.memory_space<vmem>>, vector<8x128xf32>
    tpu.vector_store %arg3[%c0_17, %c0_18], %23 {strides = array<i32>} : memref<8x128xf32, #tpu.memory_space<vmem>>, vector<8x128xf32>,
    return
  }
}

</mosaic_0001>

<bundles_post_ra>
// kernel: rectangle_gnn_forward.1
= control target key start
LH: loop header
LB: loop body
LE: loop exit
PB: predicated region body
PF: predicated region fallthrough
CT: control target
= control target key end

     0   :  { %8 = vsyncpa [#allocation3], 0  ;;  %s242_s15 = smov [#allocation2]   ;;  %s243_s17 = smov 128   ;;  %s286_s0 = inlined_call_operand.vmem [shape: f32[8,8], index: 0, kind: input, shape index: {}]   ;;  %s287_s1 = inlined_call_operand.vmem [shape: f32[8,8], index: 1, kind: input, shape index: {}]   ;;  %s288_s2 = inlined_call_operand.hbm [shape: f32[272,128], index: 2, kind: input, shape index: {}]   ;;  %s289_s3 = inlined_call_operand.vmem [shape: f32[8,128], index: 3, kind: output, shape index: {}]  }
   0x1   :  { %s17_s14 = sshll.u32 %s288_s2, 4  ;;  %s19_s16 = sshll.u32 %s242_s15, 4  ;;  %s18_s14 = int_to_ptr.hbm [resolvable:$true] %s17_s14  ;;  %s20_s16 = int_to_ptr.vmem [resolvable:$true] %s19_s16 }
   0x2   :  { %s244_s18 = smov 8  }
   0x3   :  { %25 = dma.hbm_to_vmem [thread:$0]  %s18_s14, 4352, %s20_s16, [#allocation3], %s243_s17, %s243_s17, %s244_s18  }
   0x4   :  { %240 = dma.done.wait [#allocation3], 4352  }
   0x5   :  { %241 = vsyncadd [#allocation3], 4294962944  ;;  %vm68_vm0 = vcmask 64512   ;;  %v67_v0 = vld [vmem:[%s287_s1] sm:$0xff]  ;;  %v46_v5 = vld [vmem:[#allocation2 + $0x78] sm:$0xff] }
   0x6   :  { %v274_v1 = vld [vmem:[%s286_s0] sm:$0xff]  ;;  %87 = vmatpush.msra.mxu0 %v67_v0  ;;  %v45_v6 = vld [vmem:[#allocation2 + $0x70] sm:$0xff]  ;;  %v44_v7 = vld [vmem:[#allocation2 + $0x68] sm:$0xff] }
   0x7   :  { %206 = vmatmul.msk.f32.vlgmr.msra.gmra.mxu0 %vm68_vm0, %v274_v1  ;;  %v31_v2 = vld [vmem:[#allocation2] sm:$0xff]  ;;  %v42_v9 = vld [vmem:[#allocation2 + $0x58] sm:$0xff]  ;;  %v41_v10 = vld [vmem:[#allocation2 + $0x50] sm:$0xff] }
   0x8   :  { %111 = vmatpush.msra.mxu2 %v31_v2  ;;  %v47_v4 = vld [vmem:[#allocation2 + $0x80] sm:$0xff]  ;;  %v40_v11 = vld [vmem:[#allocation2 + $0x48] sm:$0xff]  ;;  %v38_v13 = vld [vmem:[#allocation2 + $0x38] sm:$0xff] }
   0x9   :  { %138 = vmatpush.msra.mxu3 %v47_v4  ;;  %v43_v8 = vld [vmem:[#allocation2 + $0x60] sm:$0xff]  ;;  %v37_v14 = vld [vmem:[#allocation2 + $0x30] sm:$0xff]  ;;  %v36_v15 = vld [vmem:[#allocation2 + $0x28] sm:$0xff] }
   0xa   :  { %v39_v12 = vld [vmem:[#allocation2 + $0x40] sm:$0xff]  ;;  %v213_v17 = vld [vmem:[#allocation2 + $0x108] ss:$0 sm:$0xff]  ;;  %v34_v18 = vld [vmem:[#allocation2 + $0x18] sm:$0xff] }
   0xb   :  { %139 = vmatpush.msra.mxu3 %v46_v5  ;;  %v35_v16 = vld [vmem:[#allocation2 + $0x20] sm:$0xff]  ;;  %v33_v20 = vld [vmem:[#allocation2 + $0x10] sm:$0xff]  ;;  %v32_v23 = vld [vmem:[#allocation2 + $0x8] sm:$0xff] }
   0xc   :  { %v63_v25 = vld [vmem:[#allocation2 + $0x100] sm:$0xff]  ;;  %v62_v26 = vld [vmem:[#allocation2 + $0xf8] sm:$0xff]  ;;  %v61_v27 = vld [vmem:[#allocation2 + $0xf0] sm:$0xff] }
   0xd   :  { %140 = vmatpush.msra.mxu3 %v45_v6  ;;  %180 = vmatpush.msra.mxu1 %v63_v25  ;;  %v60_v28 = vld [vmem:[#allocation2 + $0xe8] sm:$0xff]  ;;  %v59_v29 = vld [vmem:[#allocation2 + $0xe0] sm:$0xff]  ;;  %v58_v30 = vld [vmem:[#allocation2 + $0xd8] sm:$0xff] }
   0xe   :  { %v57_v31 = vld [vmem:[#allocation2 + $0xd0] sm:$0xff]  ;;  %v56_v32 = vld [vmem:[#allocation2 + $0xc8] sm:$0xff]  ;;  %v55_v33 = vld [vmem:[#allocation2 + $0xc0] sm:$0xff] }
   0xf   :  { %141 = vmatpush.msra.mxu3 %v44_v7  ;;  %181 = vmatpush.msra.mxu1 %v62_v26  ;;  %v54_v34 = vld [vmem:[#allocation2 + $0xb8] sm:$0xff]  ;;  %v53_v35 = vld [vmem:[#allocation2 + $0xb0] sm:$0xff]  ;;  %v52_v36 = vld [vmem:[#allocation2 + $0xa8] sm:$0xff] }
  0x10   :  { %v51_v37 = vld [vmem:[#allocation2 + $0xa0] sm:$0xff]  ;;  %v214_v38 = vld [vmem:[#allocation2 + $0x109] ss:$0 sm:$0xff]  ;;  %v50_v39 = vld [vmem:[#allocation2 + $0x98] sm:$0xff] }
  0x11   :  { %142 = vmatpush.msra.mxu3 %v43_v8  ;;  %182 = vmatpush.msra.mxu1 %v61_v27  ;;  %v49_v41 = vld [vmem:[#allocation2 + $0x90] sm:$0xff]  ;;  %v48_v44 = vld [vmem:[#allocation2 + $0x88] sm:$0xff] }
  0x12   :  { %v215_v46 = vld [vmem:[#allocation2 + $0x10a] ss:$0 sm:$0xff] }
  0x13   :  { %143 = vmatpush.msra.mxu3 %v42_v9  ;;  %183 = vmatpush.msra.mxu1 %v60_v28 }
  0x15   :  { %144 = vmatpush.msra.mxu3 %v41_v10  ;;  %184 = vmatpush.msra.mxu1 %v59_v29 }
  0x17   :  { %145 = vmatpush.msra.mxu3 %v40_v11  ;;  %185 = vmatpush.msra.mxu1 %v58_v30 }
  0x19   :  { %146 = vmatpush.msra.mxu3 %v39_v12  ;;  %186 = vmatpush.msra.mxu1 %v57_v31 }
  0x1b   :  { %147 = vmatpush.msra.mxu3 %v38_v13  ;;  %187 = vmatpush.msra.mxu1 %v56_v32 }
  0x1d   :  { %148 = vmatpush.msra.mxu3 %v37_v14  ;;  %188 = vmatpush.msra.mxu1 %v55_v33 }
  0x1f   :  { %149 = vmatpush.msra.mxu3 %v36_v15  ;;  %189 = vmatpush.msra.mxu1 %v54_v34 }
  0x21   :  { %150 = vmatpush.msra.mxu3 %v35_v16  ;;  %190 = vmatpush.msra.mxu1 %v53_v35 }
  0x23   :  { %151 = vmatpush.msra.mxu3 %v34_v18  ;;  %191 = vmatpush.msra.mxu1 %v52_v36 }
  0x25   :  { %152 = vmatpush.msra.mxu3 %v33_v20  ;;  %192 = vmatpush.msra.mxu1 %v51_v37 }
  0x27   :  { %153 = vmatpush.msra.mxu3 %v32_v23  ;;  %193 = vmatpush.msra.mxu1 %v50_v39 }
  0x29   :  { %194 = vmatpush.msra.mxu1 %v49_v41 }
  0x2b   :  { %195 = vmatpush.msra.mxu1 %v48_v44 }
  0x84   :  { %v89_v3 = vpop.f32.mrf.mxu0 }
  0x85   :  { %207 = vmatmul.msk.f32.vlgmr.msra.gmra.mxu2 %vm68_vm0, %v89_v3 }
 0x108   :  { %v113_v19 = vpop.f32.mrf.mxu2 }
 0x109   :  { %v114_v21 = vadd.f32 %v213_v17, %v113_v19 }
 0x10b   :  { %v116_v22 = vmax.f32 %v114_v21, 0.0 }
 0x10d   :  { %132 = vmatpush.msrb.mxu2 %v116_v22 }
 0x10e   :  { %208 = vmatmul.msk.f32.vlgmr.msrb.gmra.mxu2 %vm68_vm0, %v274_v1 }
 0x191   :  { %v134_v24 = vpop.f32.mrf.mxu2 }
 0x192   :  { %154 = vmatmul.f32.vlgmr.msra.gmra.mxu3 %v134_v24 }
 0x215   :  { %v155_v40 = vpop.f32.mrf.mxu3 }
 0x216   :  { %v156_v42 = vadd.f32 %v214_v38, %v155_v40 }
 0x218   :  { %v158_v43 = vmax.f32 %v156_v42, 0.0 }
 0x21a   :  { %174 = vmatpush.msrb.mxu0 %v158_v43 }
 0x21b   :  { %209 = vmatmul.msk.f32.vlgmr.msrb.gmra.mxu0 %vm68_vm0, %v274_v1 }
 0x298   :  { %v176_v45 = vpop.f32.mrf.mxu0 }
 0x299   :  { %196 = vmatmul.f32.vlgmr.msra.gmra.mxu1 %v176_v45 }
 0x316   :  { %v197_v47 = vpop.f32.mrf.mxu1 }
 0x317   :  { %v198_v48 = vadd.f32 %v215_v46, %v197_v47 }
 0x319   :  { %200 = vst [vmem:[%s289_s3] sm:$0xff] %v198_v48 }
 0x31a   :  { %205 = vsyncpa [#allocation3], 1 }

</bundles_post_ra>
